<compile_context>
chip_gen: v5e
topology: v5e:2x2
jax: 0.10.0
libtpu: 0.0.40
codegen_flags: <defaults>
</compile_context>

<pallas_src>
import jax
import jax.numpy as jnp
from jax.experimental import pallas as pl
from jax.experimental.pallas import tpu as pltpu


def _rotary_kernel(x_ref, a_ref, t_ref, o_ref):
    # x_ref/o_ref: (TS, Dg)    a_ref: (Dg, 2*Dg) bf16    t_ref: (TS, 2*Dg) bf16
    dg = o_ref.shape[-1]
    x = x_ref[...].astype(jnp.bfloat16)                       # VPU cast, free-ish
    z = jnp.dot(x, a_ref[...], preferred_element_type=jnp.float32)   # (TS, 2*Dg)
    z = z * t_ref[...].astype(jnp.float32)                    # VPU fma
    o_ref[...] = (z[:, :dg] + z[:, dg:]).astype(o_ref.dtype)  # 128-aligned halves


def _pick_heads_per_group(H, D):
    """Heads per kernel group: smallest lane-dense (multiple-of-128) grouping,
    preferring Dg <= 512 so the per-group operator stays small."""
    cands = [g for g in range(1, H + 1) if H % g == 0 and (D * g) % 128 == 0]
    if not cands:
        return H            # no 128-aligned grouping: use the full (last-dim) width
    small = [g for g in cands if D * g <= 512]
    return max(small) if small else min(cands)


def _pick_seq_tile(S, other_programs):
    """Sequence tile. Whole sequence if small; 512-row tiles otherwise.
    If every other grid axis has a single program, split the sequence so a
    v7x megacore (2 TCs) always has >= 2 programs to shard."""
    if S > 512:
        return 512
    ts = S
    if other_programs == 1 and S >= 16:
        ts = max(8, (((S + 1) // 2 + 7) // 8) * 8)
    return ts


def combined_rotary_embedding(x, thetas, rotation_matrix, inv_freq, n_head):
    """x: (B, S, n_state) or (B, S, n_head, h_dim). Returns (B, S, n_state)."""
    if x.ndim == 4:
        b4, s4, h4, d4 = x.shape
        x = x.reshape(b4, s4, h4 * d4)
    B, S, n_state = x.shape
    H = n_head
    D = n_state // H
    K = int(thetas.shape[0])
    f32 = jnp.float32

    # ---- wrapper-side composition of all rotations (tiny O(K*D^2) work) ----
    R = jnp.eye(D, dtype=f32)
    for k in range(K):
        i, j = k % D, (k + 1) % D
        c, s = jnp.cos(thetas[k].astype(f32)), jnp.sin(thetas[k].astype(f32))
        G = jnp.eye(D, dtype=f32)
        G = G.at[i, i].set(c).at[i, j].set(-s).at[j, i].set(s).at[j, j].set(c)
        R = R @ G                                    # matches x @ G_0 @ G_1 ...
    R = R @ rotation_matrix.astype(f32)              # (D, D)

    M_e = R[:, 0::2]                                  # (D, D/2): rotated even lanes
    M_o = R[:, 1::2]                                  # (D, D/2): rotated odd  lanes
    Pe = jnp.concatenate([M_e, M_e], axis=1)          # (D, D)
    Po = jnp.concatenate([M_o, M_o], axis=1)          # (D, D)

    g = _pick_heads_per_group(H, D)
    Dg = g * D
    n_groups = n_state // Dg
    eye_g = jnp.eye(g, dtype=f32)
    # Fused per-head-group operator: one N = 2*Dg MXU push instead of two N = Dg.
    A = jnp.concatenate([jnp.kron(eye_g, Pe), jnp.kron(eye_g, Po)], axis=1)
    A = A.astype(jnp.bfloat16)                        # (Dg, 2*Dg)

    TS = _pick_seq_tile(S, B * n_groups)
    num_seq = -(-S // TS)
    S_pad = num_seq * TS                              # only the cheap table is padded

    pos = jnp.arange(S_pad, dtype=f32)
    sinusoid = pos[:, None] * inv_freq.astype(f32)[None, :]   # (S_pad, D/2)
    sin, cos = jnp.sin(sinusoid), jnp.cos(sinusoid)
    t1 = jnp.tile(jnp.concatenate([cos, sin], axis=1), (1, g))     # (S_pad, Dg)
    t2 = jnp.tile(jnp.concatenate([-sin, cos], axis=1), (1, g))    # (S_pad, Dg)
    T = jnp.concatenate([t1, t2], axis=1).astype(jnp.bfloat16)     # (S_pad, 2*Dg)

    itemsize = jnp.dtype(x.dtype).itemsize

    grid_spec = pltpu.PrefetchScalarGridSpec(
        num_scalar_prefetch=0,
        # seq outer, head-group middle, batch inner: A is always resident,
        # T is re-fetched only when the seq tile changes.
        grid=(num_seq, n_groups, B),
        in_specs=[
            pl.BlockSpec((None, TS, Dg), lambda s, hg, b: (b, s, hg)),
            pl.BlockSpec((Dg, 2 * Dg), lambda s, hg, b: (0, 0)),
            pl.BlockSpec((TS, 2 * Dg), lambda s, hg, b: (s, 0)),
        ],
        out_specs=pl.BlockSpec((None, TS, Dg), lambda s, hg, b: (b, s, hg)),
    )

    # VMEM budget sized from the actual double-buffered blocks (+ headroom).
    x_blk = TS * Dg * itemsize
    t_blk = TS * 2 * Dg * 2
    a_blk = Dg * 2 * Dg * 2
    need = 2 * (2 * x_blk) + 2 * t_blk + 2 * a_blk
    vmem_limit = int(min(64 << 20, max(8 << 20, 2 * need + (4 << 20))))

    cost = pl.CostEstimate(
        flops=4 * B * S * n_state * Dg + 4 * B * S * n_state,
        transcendentals=0,
        bytes_accessed=(2 * B * S * n_state * itemsize
                        + S_pad * 2 * Dg * 2
                        + Dg * 2 * Dg * 2),
    )

    out = pl.pallas_call(
        _rotary_kernel,
        out_shape=jax.ShapeDtypeStruct((B, S, n_state), x.dtype),
        grid_spec=grid_spec,
        compiler_params=pltpu.CompilerParams(
            dimension_semantics=("parallel", "parallel", "parallel"),
            vmem_limit_bytes=vmem_limit),
        cost_estimate=cost,
    )(x, A, T)
    return out


def reference(x, thetas, rotation_matrix, inv_freq, n_head):
    """Pure-JAX transcription of the PyTorch _forward for verification (f32)."""
    B, S, n_state = x.shape
    H = n_head
    D = n_state // H
    K = int(thetas.shape[0])
    xr = x.reshape(-1, D)
    for k in range(K):
        i, j = k % D, (k + 1) % D
        th = thetas[k]
        G = jnp.eye(D, dtype=jnp.float32)
        G = (G.at[i, i].set(jnp.cos(th)).at[i, j].set(-jnp.sin(th))
              .at[j, i].set(jnp.sin(th)).at[j, j].set(jnp.cos(th)))
        xr = xr @ G
    xr = xr @ rotation_matrix
    x4 = xr.reshape(B, S, H, D)
    sinusoid = jnp.arange(S, dtype=jnp.float32)[:, None] * inv_freq[None, :]
    sin = jnp.sin(sinusoid)[None, :, None, :]
    cos = jnp.cos(sinusoid)[None, :, None, :]
    x1, x2 = x4[..., ::2], x4[..., 1::2]
    out = jnp.concatenate([x1 * cos - x2 * sin, x1 * sin + x2 * cos], axis=-1)
    return out.reshape(B, S, n_state)


if __name__ == "__main__":
    # Module config: n_state=128, n_head=4 -> h_dim=32; num_rotations=4; base=10000.
    B, S, n_state, n_head = 2, 8, 128, 4
    D = n_state // n_head
    num_rotations = 4
    base = 10000.0

    key = jax.random.PRNGKey(0)
    kx, kt, kr = jax.random.split(key, 3)
    x = jax.random.normal(kx, (B, S, n_state), dtype=jnp.float32)

    # Deterministic parameter init (shapes from __init__): thetas (num_rotations,),
    # rotation_matrix (h_dim, h_dim) -- orthogonal like reset_parameters().
    thetas = 0.3 * jax.random.normal(kt, (num_rotations,), dtype=jnp.float32)
    rotation_matrix, _ = jnp.linalg.qr(
        jax.random.normal(kr, (D, D), dtype=jnp.float32))
    inv_freq = 1.0 / (base ** (jnp.arange(0, D, 2, dtype=jnp.float32) / D))

    out = combined_rotary_embedding(x, thetas, rotation_matrix, inv_freq, n_head)
    out = jax.block_until_ready(out)

    ref = reference(x, thetas, rotation_matrix, inv_freq, n_head)
    assert out.shape == (B, S, n_state)
    assert jnp.allclose(out, ref, rtol=2e-2, atol=2e-2), \
        float(jnp.max(jnp.abs(out - ref)))
    print("KERNEL_OK")
</pallas_src>

<mosaic_0001>
module attributes {stable_mosaic.version = 11 : i64} {
  func.func @_rotary_kernel(%arg0: i32, %arg1: i32, %arg2: i32, %arg3: memref<1x8x128xf32, #tpu.memory_space<vmem>>, %arg4: memref<128x256xbf16, #tpu.memory_space<vmem>>, %arg5: memref<8x256xbf16, #tpu.memory_space<vmem>>, %arg6: memref<1x8x128xf32, #tpu.memory_space<vmem>>) attributes {dimension_semantics = [#tpu.dimension_semantics<parallel>, #tpu.dimension_semantics<parallel>, #tpu.dimension_semantics<parallel>], iteration_bounds = array<i64: 1, 1, 2>, scalar_prefetch = 0 : i64, scratch_operands = 0 : i64, tpu.core_type = #tpu.core_type<tc>, window_params = [{transform_indices = @transform_0, window_bounds = array<i64: 1, 8, 128>}, {pipeline_mode = #tpu.pipeline_mode<synchronous>, transform_indices = @transform_1, window_bounds = array<i64: 128, 256>}, {transform_indices = @transform_2, window_bounds = array<i64: 8, 256>}, {transform_indices = @transform_3, window_bounds = array<i64: 1, 8, 128>}]} {
    %c0 = arith.constant 0 : index
    %c0_0 = arith.constant 0 : index
    %c0_1 = arith.constant 0 : index
    %0 = vector.load %arg3[%c0, %c0_0, %c0_1] : memref<1x8x128xf32, #tpu.memory_space<vmem>>, vector<1x8x128xf32>
    %1 = vector.shape_cast %0 : vector<1x8x128xf32> to vector<8x128xf32>
    %2 = arith.truncf %1 : vector<8x128xf32> to vector<8x128xbf16>
    %c0_2 = arith.constant 0 : index
    %c0_3 = arith.constant 0 : index
    %3 = vector.load %arg4[%c0_2, %c0_3] : memref<128x256xbf16, #tpu.memory_space<vmem>>, vector<128x256xbf16>
    %cst = arith.constant dense<0.000000e+00> : vector<8x256xf32>
    %4 = tpu.matmul %2, %3, %cst {dimension_numbers = #tpu.dot_dimension_numbers<[1], [0], [0], [1], [0, 0, 1, 1], [], []>} : vector<8x128xbf16>, vector<128x256xbf16>, vector<8x256xf32> -> vector<8x256xf32>
    %c0_4 = arith.constant 0 : index
    %c0_5 = arith.constant 0 : index
    %5 = vector.load %arg5[%c0_4, %c0_5] : memref<8x256xbf16, #tpu.memory_space<vmem>>, vector<8x256xbf16>
    %6 = arith.extf %5 : vector<8x256xbf16> to vector<8x256xf32>
    %7 = arith.mulf %4, %6 : vector<8x256xf32>
    %8 = vector.extract_strided_slice %7 {offsets = [0, 0], sizes = [8, 128], strides = [1, 1]} : vector<8x256xf32> to vector<8x128xf32>
    %9 = vector.extract_strided_slice %7 {offsets = [0, 128], sizes = [8, 128], strides = [1, 1]} : vector<8x256xf32> to vector<8x128xf32>
    %10 = arith.addf %8, %9 : vector<8x128xf32>
    %c0_6 = arith.constant 0 : index
    %c0_7 = arith.constant 0 : index
    %c0_8 = arith.constant 0 : index
    %11 = vector.load %arg6[%c0_6, %c0_7, %c0_8] : memref<1x8x128xf32, #tpu.memory_space<vmem>>, vector<1x8x128xf32>
    %12 = vector.shape_cast %11 : vector<1x8x128xf32> to vector<8x128xf32>
    %13 = vector.shape_cast %10 : vector<8x128xf32> to vector<1x8x128xf32>
    tpu.vector_store %arg6[%c0_6, %c0_7, %c0_8], %13 {strides = array<i32>} : memref<1x8x128xf32, #tpu.memory_space<vmem>>, vector<1x8x128xf32>,
    return
  }
  func.func @transform_0(%arg0: i32, %arg1: i32, %arg2: i32) -> (i32, i32, i32) {
    %c0_i32 = arith.constant 0 : i32
    return %arg2, %arg0, %arg1 : i32, i32, i32
  }
  func.func @transform_1(%arg0: i32, %arg1: i32, %arg2: i32) -> (i32, i32) {
    %c0_i32 = arith.constant 0 : i32
    %c0_i32_0 = arith.constant 0 : i32
    %c0_i32_1 = arith.constant 0 : i32
    return %c0_i32, %c0_i32_0 : i32, i32
  }
  func.func @transform_2(%arg0: i32, %arg1: i32, %arg2: i32) -> (i32, i32) {
    %c0_i32 = arith.constant 0 : i32
    %c0_i32_0 = arith.constant 0 : i32
    return %arg0, %c0_i32 : i32, i32
  }
  func.func @transform_3(%arg0: i32, %arg1: i32, %arg2: i32) -> (i32, i32, i32) {
    %c0_i32 = arith.constant 0 : i32
    return %arg2, %arg0, %arg1 : i32, i32, i32
  }
}

</mosaic_0001>

<bundles_post_ra>
// kernel: tpu_custom_call.1
= control target key start
LH: loop header
LB: loop body
LE: loop exit
PB: predicated region body
PF: predicated region fallthrough
CT: control target
= control target key end

     0   :  { %8 = vsyncpa [#allocation3], 0  ;;  %s1046_s0 = inlined_call_operand.hbm [shape: f32[2,8,128], index: 0, kind: input, shape index: {}]   ;;  %s1047_s1 = inlined_call_operand.hbm [shape: bf16[128,256], index: 1, kind: input, shape index: {}]   ;;  %s1048_s2 = inlined_call_operand.hbm [shape: bf16[8,256], index: 2, kind: input, shape index: {}]   ;;  %s1049_s3 = inlined_call_operand.hbm [shape: f32[2,8,128], index: 3, kind: output, shape index: {}]  }
   0x1   :  { %10 = vsyncpa [#allocation3 + $0x1], 0 }
   0x2   :  { %11 = vsyncpa [#allocation6], 0 }
   0x3   :  { %12 = vsyncpa [#allocation4], 0 }
   0x4   :  { %14 = vsyncpa [#allocation4 + $0x1], 0  ;;  %s895_s12 = smov 0   ;;  %s897_s13 = smov 0  }
   0x5   :  { %s899_s14 = smov 0   ;;  %s901_s15 = smov 0  }
   0x6   :  { %s903_s16 = smov 0   ;;  %s905_s17 = smov 0  }
   0x7 LB: > { %s511_s18 = sadd.s32 4294967295, %s869_s17   ;;  %p513_p0 = scmp.ge.s32.totalorder %s869_s17, 1  ;;  %s869_s17 = sphi %s905_s17, %s20_s17   ;;  %s865_s16 = sphi %s903_s16, %s1059_s16   ;;  %s861_s15 = sphi %s901_s15, %s1058_s15   ;;  %s857_s14 = sphi %s899_s14, %s1057_s14   ;;  %s853_s13 = sphi %s897_s13, %s1056_s13   ;;  %s849_s12 = sphi %s895_s12, %s1055_s12  }
   0x8   : > { %p929_p1 = scmp.eq.s32.totalorder %s511_s18, 0  ;;  %p151_p2 = scmp.lt.s32.totalorder %s869_s17, 3 }
   0x9   : > { %s162_s22 = sshll.u32 %s1047_s1, 4  ;;  %s871_s24 = smov [#allocation5]   ;;  %s163_s22 = int_to_ptr.hbm [resolvable:$true] %s162_s22 }
   0xa   : > { %p937_p3 = pnand %p513_p0, %p151_p2  ;;  %s164_s25 = sshll.u32 %s871_s24, 4  ;;  %s165_s25 = int_to_ptr.vmem [resolvable:$true] %s164_s25 }
   0xb   : > { %p516_p6 = scmp.ge.s32.totalorder %s869_s17, 2  ;;  %s180_s28 = sshll.u32 %s1048_s2, 4  ;;  %s181_s28 = int_to_ptr.hbm [resolvable:$true] %s180_s28 }
   0xc   : > { %p620_p4 = pneg %p937_p3  ;;  %s872_s29 = smov 128  }
   0xd   : > { %s873_s30 = smov 8   ;;  %s874_s4 = smov [#allocation7]  }
   0xe   : > { %p621_p5 = pnand %p620_p4, %p929_p1  ;;  %s182_s5 = sshll.u32 %s874_s4, 4  ;;  %s183_s5 = int_to_ptr.vmem [resolvable:$true] %s182_s5 }
   0xf   : > { %s32_s6 = sadd.s32 1, %s865_s16  ;;  %s512_s7 = sadd.s32 4294967294, %s869_s17  }
  0x10   : > { %623 = dma.hbm_to_vmem [thread:$0]  (!%p621_p5), %s163_s22, 2048, %s165_s25, [#allocation6], %s872_s29, %s872_s29, %s873_s30  }
  0x11   : > { %626 = dma.hbm_to_vmem [thread:$0]  (!%p621_p5), %s181_s28, 128, %s183_s5, [#allocation6]  }
  0x12   : > { %p33_p7 = scmp.ge.s32.totalorder %s32_s6, 2  ;;  %s50_s8 = sadd.s32 1, %s857_s14 }
  0x13   : > { %p57_p8 = scmp.ne.s32.totalorder %s857_s14, %s853_s13  ;;  %p58_p9 = scmp.eq.s32.totalorder %s869_s17, 0 }
  0x14   : > { %s1061_s6 = smov (%p33_p7, %s32_s6), 0  ;;  %p63_p10 = scmp.ne.s32.totalorder %s853_s13, %s849_s12 }
  0x15   : > { %s43_s9 = ssub.s32 %s865_s16, %s1061_s6  ;;  %p138_p11 = scmp.eq.s32.totalorder %s511_s18, 1 }
  0x16   : > { %p48_p12 = scmp.eq.s32.totalorder %s43_s9, 0  ;;  %p965_p13 = por %p929_p1, %p63_p10 }
  0x17   : > { %p969_p0 = por %p138_p11, %p57_p8  ;;  %p144_p2 = scmp.eq.s32.totalorder %s512_s7, 1 }
  0x18   : > { %s974_s20 = scalar_select %p48_p12, %s857_s14, %s50_s8  }
  0x19   : > { %p59_p4 = por %p58_p9, %p57_p8  ;;  %p976_p5 = por %p144_p2, %p63_p10 }
  0x1a   : > { %s193_s22 = sand.u32 1, %s857_s14   ;;  %s518_s18 = sshll.u32 %s865_s16, 3 }
  0x1b   : > { %p637_p7 = scmp.lt.s32.totalorder %s869_s17, 2  ;;  %s517_s24 = sshll.u32 %s193_s22, 3 }
  0x1c   : > { %s203_s27 = scalar_lea.hbm %s1046_s0, %s518_s18  ;;  %s197_s29 = scalar_lea.vmem [#allocation2], %s517_s24 }
  0x1d   : > { %s205_s28 = sshll.u32 %s203_s27, 4  ;;  %s207_s30 = sshll.u32 %s197_s29, 4  ;;  %s206_s28 = int_to_ptr.hbm [resolvable:$true] %s205_s28  ;;  %s208_s30 = int_to_ptr.vmem [resolvable:$true] %s207_s30 }
  0x1e   : > { %p628_p11 = pnand %p637_p7, %p59_p4  ;;  %s194_s4 = scalar_lea.sflag [#allocation3], %s193_s22 }
  0x1f   : > { %216 = sbr.rel (%p937_p3) target bundleno = 208 (0xd0), region = 32  ;;  %s989_s5 = sand.u32 (!%p937_p3), 1, %s853_s13  }
  0x20   : > { %630 = dma.hbm_to_vmem [thread:$0]  (!%p628_p11), %s206_s28, 128, %s208_s30, %s194_s4  }
  0x21   : > { %s520_s7 = sshll.u32 (!%p937_p3), %s989_s5, 3  ;;  %s219_s8 = scalar_lea.sflag (!%p937_p3), [#allocation3], %s989_s5 }
  0x22   : > { %s995_s9 = scalar_lea.vmem (!%p937_p3), [#allocation2], %s520_s7 }
  0x24   : > { %836 = dma.done.wait (%p965_p13), %s219_s8, 128  }
  0x25   : > { %838 = vsyncadd (%p965_p13), %s219_s8, 4294967168 }
  0x26   : > { %840 = dma.done.wait (%p929_p1), [#allocation6], 2176  }
  0x27   : > { %842 = vsyncadd (%p929_p1), [#allocation6], 4294965120  ;;  %v582_v0 = vld [vmem:[#allocation5 + $0x70] sm:$0xf]  ;;  %v607_v1 = vld [vmem:[#allocation5 + $0x74] sm:$0xf0] }
  0x28   : > { %v606_v2 = vld [vmem:[#allocation5 + $0x74] sm:$0xf]  ;;  %v583_v3 = vor.u32 %v607_v1, %v582_v0  ;;  %v584_v4 = vld [vmem:[#allocation5 + $0x78] sm:$0xf0]  ;;  %v574_v5 = vld [vmem:[#allocation5 + $0x60] sm:$0xf] }
  0x29   : > { %v605_v6 = vld [vmem:[#allocation5 + $0x64] sm:$0xf0]  ;;  %v587_v7 = vor.u32 %v606_v2, %v584_v4  ;;  %v604_v8 = vld [vmem:[#allocation5 + $0x64] sm:$0xf]  ;;  %v576_v9 = vld [vmem:[#allocation5 + $0x68] sm:$0xf0] }
  0x2a   : > { %354 = vmatpush.bf16.msra.mxu0 %v583_v3  ;;  %v575_v10 = vor.u32 %v605_v6, %v574_v5  ;;  %v579_v11 = vor.u32 %v604_v8, %v576_v9  ;;  %v566_v12 = vld [vmem:[#allocation5 + $0x50] sm:$0xf]  ;;  %v603_v13 = vld [vmem:[#allocation5 + $0x54] sm:$0xf0]  ;;  %v602_v14 = vld [vmem:[#allocation5 + $0x54] sm:$0xf] }
  0x2b   : > { %367 = vmatpush.bf16.msra.mxu1 %v587_v7  ;;  %v568_v15 = vld [vmem:[#allocation5 + $0x58] sm:$0xf0]  ;;  %v567_v16 = vor.u32 %v603_v13, %v566_v12  ;;  %v558_v18 = vld [vmem:[#allocation5 + $0x40] sm:$0xf]  ;;  %v601_v19 = vld [vmem:[#allocation5 + $0x44] sm:$0xf0] }
  0x2c   : > { %v571_v17 = vor.u32 %v602_v14, %v568_v15  ;;  %v600_v20 = vld [vmem:[#allocation5 + $0x44] sm:$0xf]  ;;  %v560_v21 = vld [vmem:[#allocation5 + $0x48] sm:$0xf0]  ;;  %v559_v22 = vor.u32 %v601_v19, %v558_v18  ;;  %v550_v24 = vld [vmem:[#allocation5 + $0x30] sm:$0xf] }
  0x2d   : > { %v563_v23 = vor.u32 %v600_v20, %v560_v21  ;;  %v599_v25 = vld [vmem:[#allocation5 + $0x34] sm:$0xf0]  ;;  %v598_v26 = vld [vmem:[#allocation5 + $0x34] sm:$0xf]  ;;  %v552_v27 = vld [vmem:[#allocation5 + $0x38] sm:$0xf0] }
  0x2e   : > { %355 = vmatpush.bf16.msra.mxu0 %v575_v10  ;;  %v551_v28 = vor.u32 %v599_v25, %v550_v24  ;;  %v555_v29 = vor.u32 %v598_v26, %v552_v27  ;;  %v542_v30 = vld [vmem:[#allocation5 + $0x20] sm:$0xf]  ;;  %v597_v31 = vld [vmem:[#allocation5 + $0x24] sm:$0xf0]  ;;  %v596_v32 = vld [vmem:[#allocation5 + $0x24] sm:$0xf] }
  0x2f   : > { %368 = vmatpush.bf16.msra.mxu1 %v579_v11  ;;  %v544_v33 = vld [vmem:[#allocation5 + $0x28] sm:$0xf0]  ;;  %v543_v34 = vor.u32 %v597_v31, %v542_v30  ;;  %v534_v36 = vld [vmem:[#allocation5 + $0x10] sm:$0xf]  ;;  %v595_v37 = vld [vmem:[#allocation5 + $0x14] sm:$0xf0] }
  0x30   : > { %v547_v35 = vor.u32 %v596_v32, %v544_v33  ;;  %v594_v38 = vld [vmem:[#allocation5 + $0x14] sm:$0xf]  ;;  %v536_v39 = vld [vmem:[#allocation5 + $0x18] sm:$0xf0]  ;;  %v535_v40 = vor.u32 %v595_v37, %v534_v36  ;;  %v526_v42 = vld [vmem:[#allocation5] sm:$0xf] }
  0x31   : > { %v539_v41 = vor.u32 %v594_v38, %v536_v39  ;;  %v593_v43 = vld [vmem:[#allocation5 + $0x4] sm:$0xf0]  ;;  %v592_v44 = vld [vmem:[#allocation5 + $0x4] sm:$0xf]  ;;  %v528_v45 = vld [vmem:[#allocation5 + $0x8] sm:$0xf0] }
  0x32   : > { %356 = vmatpush.bf16.msra.mxu0 %v567_v16  ;;  %v527_v46 = vor.u32 %v593_v43, %v526_v42  ;;  %v256_v47 = vld [vmem:[%s995_s9] sm:$0xff]  ;;  %v531_v48 = vor.u32 %v592_v44, %v528_v45  ;;  %v380_v50 = vld [vmem:[#allocation7] sm:$0xff]  ;;  %s589_s19 = sshll.u32 %s861_s15, 3  ;;  %s255_s18 = scalar_lea.vmem [#allocation8], %s520_s7 }
  0x33   : > { %369 = vmatpush.bf16.msra.mxu1 %v571_v17  ;;  %v257_v49 = vpack.c.bf16 %v256_v47, %v256_v47  ;;  %v381_v51 = vunpack.c.l.bf16 %v380_v50  ;;  %v382_v52 = vunpack.c.h.bf16 %v380_v50  ;;  %s400_s22 = scalar_lea.hbm %s1049_s3, %s589_s19  ;;  %s402_s24 = sshll.u32 %s255_s18, 4  ;;  %s403_s24 = int_to_ptr.vmem [resolvable:$true] %s402_s24 }
  0x34   : > { %s404_s25 = sshll.u32 %s400_s22, 4  ;;  %s388_s15 = scalar_lea.sflag [#allocation4], %s989_s5  ;;  %s405_s25 = int_to_ptr.hbm [resolvable:$true] %s404_s25 }
  0x35   : > { %s797_s26 = sshra.s32 %s405_s25, 4  ;;  %s803_s30 = scalar_lea.hbm %s1049_s3, 16  ;;  %s798_s26 = int_to_ptr.hbm [resolvable:$true] %s797_s26 }
  0x36   : > { %357 = vmatpush.bf16.msra.mxu0 %v559_v22  ;;  %s799_s27 = scalar_lea.hbm %s798_s26, 8  ;;  %p804_p9 = scmp.lt.s32.totalorder %s798_s26, %s1049_s3 }
  0x37   : > { %370 = vmatpush.bf16.msra.mxu1 %v563_v23  ;;  %p800_p1 = scmp.ne.s32.totalorder %s798_s26, %s799_s27  ;;  %p805_p10 = scmp.lt.s32.totalorder %s803_s30, %s799_s27 }
  0x39   : > { %p801_p3 = pnand %p800_p1, %p969_p0  ;;  %p806_p12 = por %p805_p10, %p804_p9 }
  0x3a   : > { %358 = vmatpush.bf16.msra.mxu0 %v551_v28 }
  0x3b   : > { %371 = vmatpush.bf16.msra.mxu1 %v555_v29  ;;  %p802_p8 = pneg %p801_p3 }
  0x3d   : > { %p807_p13 = pnand %p806_p12, %p802_p8 }
  0x3e   : > { %359 = vmatpush.bf16.msra.mxu0 %v543_v34 }
  0x3f   : > { %372 = vmatpush.bf16.msra.mxu1 %v547_v35 }
  0x42   : > { %360 = vmatpush.bf16.msra.mxu0 %v535_v40 }
  0x43   : > { %373 = vmatpush.bf16.msra.mxu1 %v539_v41 }
  0x46   : > { %361 = vmatpush.bf16.msra.mxu0 %v527_v46 }
  0x47   : > { %374 = vmatpush.bf16.msra.mxu1 %v531_v48 }
  0x49   : > { %362 = vmatmul.bf16.vlgmr.msra.gmra.mxu0 %v257_v49 }
  0x4a   : > { %375 = vmatmul.bf16.vlgmr.msra.gmra.mxu1 %v257_v49 }
  0xc6   : > { %v363_v53 = vpop.f32.mrf.mxu0 }
  0xc7   : > { %v383_v54 = vmul.f32 %v381_v51, %v363_v53  ;;  %v376_v55 = vpop.f32.mrf.mxu1 }
  0xc8   : > { %v384_v56 = vmul.f32 %v382_v52, %v376_v55 }
  0xca   : > { %v385_v57 = vadd.f32 %v384_v56, %v383_v54 }
  0xcc   : > { %386 = vst [vmem:[%s255_s18] sm:$0xff] %v385_v57 }
  0xcd   : > { %810 = shalt.err (!%p807_p13)
}
  0xce   : > { %618 = dma.vmem_to_hbm [thread:$0]  (%p969_p0), %s403_s24, 128, %s405_s25, %s388_s15   ;;  %v365_v58 = vpop.f32.mrf.mxu0 }
  0xcf   : > { %v378_v59 = vpop.f32.mrf.mxu1 }
  0xd0 PF: > { %s416_s5 = sand.u32 1, %s849_s12   ;;  %p632_p2 = pnand %p516_p6, %p976_p5 }
  0xd1   : > { %s417_s8 = scalar_lea.sflag [#allocation4], %s416_s5 }
  0xd2   : > { %p633_p4 = pneg %p632_p2 }
  0xd4   : > { %844 = dma.done.wait (%p633_p4), %s417_s8, 128  }
  0xd5   : > { %846 = vsyncadd (%p633_p4), %s417_s8, 4294967168  ;;  %s20_s17 = sadd.s32 1, %s869_s17   ;;  %s1055_s12 = smov %s853_s13 }
  0xd6   : > { %p17_p7 = scmp.ge.s32.totalorder %s20_s17, 4   ;;  %s1056_s13 = smov %s857_s14 }
  0xd7   : > { %s1057_s14 = smov %s974_s20  ;;  %s1058_s15 = smov %s865_s16 }
  0xd8   : > { %s1059_s16 = smov %s1061_s6  ;;  %19 = sbr.rel (!%p17_p7) target bundleno = 7 (0x7), region = 86 }
  0xdd   :  { %423 = vsyncpa [#allocation3], 1 }
  0xde   :  { %425 = vsyncpa [#allocation3 + $0x1], 1 }
  0xdf   :  { %426 = vsyncpa [#allocation6], 1 }
  0xe0   :  { %427 = vsyncpa [#allocation4], 1 }
  0xe1   :  { %429 = vsyncpa [#allocation4 + $0x1], 1 }

</bundles_post_ra>
